<compile_context>
chip_gen: v5e
topology: v5e:2x2
jax: 0.10.0
libtpu: 0.0.40
codegen_flags: <defaults>
</compile_context>

<pallas_src>
import jax
import jax.numpy as jnp
from jax.experimental import pallas as pl
from jax.experimental.pallas import tpu as pltpu

# ---- module hyper-parameters (MultiScaleEncoder defaults) --------------------
INPUT_DIM = 3
NUM_SCALES = 4
BASE_FREQS = 4
MAX_FREQS = 10
INCLUDE_INPUT = True
CURRENT_STAGE = 0  # ProgressivePositionalEncoder.current_stage after __init__

_BASE_ROWS = INPUT_DIM if INCLUDE_INPUT else 0
_DIST_THRESHOLDS = (100.0, 50.0, 25.0)  # the 10.0 bucket collapses into scale 3


def _freqs_for_scale(scale: int) -> int:
    f = BASE_FREQS + scale * ((MAX_FREQS - BASE_FREQS) // (NUM_SCALES - 1))
    return min(f, MAX_FREQS)


def _current_freqs(num_freqs_max: int, current_stage: int = CURRENT_STAGE) -> int:
    # mirrors ProgressivePositionalEncoder.get_current_freqs (hard-coded "4 - 1")
    progress = current_stage / max(1, 4 - 1)
    cf = BASE_FREQS + int(progress * (num_freqs_max - BASE_FREQS))
    return min(cf, num_freqs_max)


def _encoder_out_dim(num_freqs_max: int) -> int:
    return _BASE_ROWS + 2 * num_freqs_max * INPUT_DIM


def _active_rows(cur_freqs: int) -> int:
    return _BASE_ROWS + 2 * cur_freqs * INPUT_DIM


def _freq_bands(n: int):
    # log_sampling=True: 2 ** linspace(0, M-1, M) == [1, 2, 4, ..., 2^(M-1)]
    return [float(2.0 ** i) for i in range(n)]


def _pick_tile(n: int, tile_n: int) -> int:
    """Lane-tile: multiple of 128, <= padded N, split so the grid has >=2 steps
    when there is enough work (v7x has two TensorCores)."""
    n_pad = ((n + 127) // 128) * 128
    tn = max(128, (int(tile_n) // 128) * 128)
    tn = min(tn, n_pad)
    if tn >= n_pad and n_pad >= 2048:
        tn = ((n_pad // 2 + 127) // 128) * 128
    return tn


def _compiler_params(out_rows: int, tn: int, extra_in_rows: int, out_bytes: int):
    """Explicit VMEM limit sized from the double-buffered tiles + headroom."""
    pad8 = lambda r: ((r + 7) // 8) * 8
    est = 2 * pad8(out_rows) * tn * out_bytes          # output double buffer
    est += 2 * pad8(INPUT_DIM) * tn * 4                # x double buffer (f32)
    if extra_in_rows:
        est += 2 * pad8(extra_in_rows) * tn * 4        # distances double buffer
    est += 8 * pad8(out_rows) * tn * 4                 # stacked args / sin / cos headroom
    limit = int(min(64 << 20, max(32 << 20, est * 5 // 4)))
    return pltpu.CompilerParams(
        dimension_semantics=("parallel",),
        vmem_limit_bytes=limit,
    )


# ---- Pallas kernels ----------------------------------------------------------
def _make_scale_kernel(cur_freqs: int):
    cf = cur_freqs
    bands = _freq_bands(cf)

    def kernel(x_ref, o_ref):
        xin = x_ref[...]                                 # (3, tn)
        x32 = xin.astype(jnp.float32)
        if INCLUDE_INPUT:
            o_ref[0:INPUT_DIM, :] = xin.astype(o_ref.dtype)
        if cf > 0:
            # Band-stacked arguments: (3*cf, tn), band-major. Scalar per-band multiply
            # is cheap VPU work; the expensive sin/cos run dense over the whole stack.
            fx = jnp.concatenate([x32 * bands[i] for i in range(cf)], axis=0)
            s = jnp.sin(fx)                              # one dense EUP pass
            c = jnp.cos(fx)                              # one dense EUP pass
            for i in range(cf):
                src = slice(INPUT_DIM * i, INPUT_DIM * (i + 1))
                r = _BASE_ROWS + 2 * INPUT_DIM * i
                o_ref[r:r + INPUT_DIM, :] = s[src, :].astype(o_ref.dtype)
                o_ref[r + INPUT_DIM:r + 2 * INPUT_DIM, :] = c[src, :].astype(o_ref.dtype)

    return kernel


def _make_adaptive_kernel():
    nfs = [_freqs_for_scale(s) for s in range(NUM_SCALES)]   # [4, 6, 8, 10]
    cfs = [_current_freqs(nf) for nf in nfs]                 # active bands per scale
    cf_min, cf_max = min(cfs), max(cfs)
    bands = _freq_bands(cf_max)

    def kernel(x_ref, d_ref, o_ref):
        xin = x_ref[...]                                 # (3, tn)
        x32 = xin.astype(jnp.float32)
        if INCLUDE_INPUT:
            o_ref[0:INPUT_DIM, :] = xin.astype(o_ref.dtype)
        if cf_max > 0:
            fx = jnp.concatenate([x32 * bands[i] for i in range(cf_max)], axis=0)
            s = jnp.sin(fx)                              # (3*cf_max, tn) dense
            c = jnp.cos(fx)
            if cf_max > cf_min:
                # per-point number of active bands from the distance thresholds:
                # d>=100 -> scale0, 50<=d<100 -> scale1, 25<=d<50 -> scale2, d<25 -> scale3
                d = d_ref[...].astype(jnp.float32)       # (1, tn)
                cf_pt = jnp.where(
                    d >= _DIST_THRESHOLDS[0], cfs[0],
                    jnp.where(d >= _DIST_THRESHOLDS[1], cfs[1],
                              jnp.where(d >= _DIST_THRESHOLDS[2], cfs[2], cfs[3])),
                ).astype(jnp.int32)
                # one dense activity mask over the whole stacked block:
                # row r belongs to band r // 3, so (r // 3 < cf_pt) == (r < 3 * cf_pt)
                row = jax.lax.broadcasted_iota(
                    jnp.int32, (INPUT_DIM * cf_max, 1), 0)
                m = (row < INPUT_DIM * cf_pt).astype(jnp.float32)
                s = s * m
                c = c * m
            for i in range(cf_max):
                src = slice(INPUT_DIM * i, INPUT_DIM * (i + 1))
                r = _BASE_ROWS + 2 * INPUT_DIM * i
                o_ref[r:r + INPUT_DIM, :] = s[src, :].astype(o_ref.dtype)
                o_ref[r + INPUT_DIM:r + 2 * INPUT_DIM, :] = c[src, :].astype(o_ref.dtype)

    return kernel


# ---- lane-dense pallas_call wrappers -----------------------------------------
def _encode_scale_lanes(x_t, scale: int, tile_n: int, out_dtype):
    n = x_t.shape[1]
    scale = min(scale, NUM_SCALES - 1)
    nf = _freqs_for_scale(scale)
    cf = _current_freqs(nf)
    act_rows = _active_rows(cf)
    tn = _pick_tile(n, tile_n)
    out_dtype = x_t.dtype if out_dtype is None else out_dtype
    out_bytes = jnp.dtype(out_dtype).itemsize

    return pl.pallas_call(
        _make_scale_kernel(cf),
        out_shape=jax.ShapeDtypeStruct((act_rows, n), out_dtype),
        grid_spec=pltpu.PrefetchScalarGridSpec(
            num_scalar_prefetch=0,
            grid=(pl.cdiv(n, tn),),
            in_specs=[pl.BlockSpec((INPUT_DIM, tn), lambda i: (0, i))],
            out_specs=pl.BlockSpec((act_rows, tn), lambda i: (0, i)),
        ),
        compiler_params=_compiler_params(act_rows, tn, 0, out_bytes),
    )(x_t)


def _encode_adaptive_lanes(x_t, d_t, tile_n: int, out_dtype):
    n = x_t.shape[1]
    cf_max = max(_current_freqs(_freqs_for_scale(s)) for s in range(NUM_SCALES))
    act_rows = _active_rows(cf_max)
    tn = _pick_tile(n, tile_n)
    out_dtype = x_t.dtype if out_dtype is None else out_dtype
    out_bytes = jnp.dtype(out_dtype).itemsize

    return pl.pallas_call(
        _make_adaptive_kernel(),
        out_shape=jax.ShapeDtypeStruct((act_rows, n), out_dtype),
        grid_spec=pltpu.PrefetchScalarGridSpec(
            num_scalar_prefetch=0,
            grid=(pl.cdiv(n, tn),),
            in_specs=[
                pl.BlockSpec((INPUT_DIM, tn), lambda i: (0, i)),
                pl.BlockSpec((1, tn), lambda i: (0, i)),
            ],
            out_specs=pl.BlockSpec((act_rows, tn), lambda i: (0, i)),
        ),
        compiler_params=_compiler_params(act_rows, tn, 1, out_bytes),
    )(x_t, d_t)


# ---- public API --------------------------------------------------------------
def multi_scale_encode_lanes(x, scale: int = 0, distances=None, *,
                             tile_n: int = 16384, out_dtype=None,
                             lane_dense_input: bool = False,
                             pad_to_output_dim: bool = False):
    """Lane-dense variant: returns [active_rows, N] where active_rows = 3 + 6*cf.

    Only the non-zero rows of the encoding are computed/written (the inactive
    frequency bands of the module output are structurally zero at the current
    stage). Preferred entry point for fused consumers (e.g. first MLP matmul);
    set pad_to_output_dim=True to zero-pad up to the module's declared out_dim."""
    x_t = x if lane_dense_input else jnp.transpose(x)          # [3, N]
    if distances is not None:
        d_t = distances.reshape(1, -1).astype(jnp.float32)
        y = _encode_adaptive_lanes(x_t, d_t, tile_n, out_dtype)
        full = max(_encoder_out_dim(_freqs_for_scale(s)) for s in range(NUM_SCALES))
    else:
        y = _encode_scale_lanes(x_t, scale, tile_n, out_dtype)
        full = _encoder_out_dim(_freqs_for_scale(min(scale, NUM_SCALES - 1)))
    if pad_to_output_dim and y.shape[0] < full:
        y = jnp.concatenate(
            [y, jnp.zeros((full - y.shape[0], y.shape[1]), y.dtype)], axis=0)
    return y


def multi_scale_encode(x, scale: int = 0, distances=None, *,
                       tile_n: int = 16384, out_dtype=None):
    """Pallas implementation of MultiScaleEncoder.forward: x [N, 3] -> [N, out_dim]."""
    if distances is not None:
        full = max(_encoder_out_dim(_freqs_for_scale(s)) for s in range(NUM_SCALES))
    else:
        full = _encoder_out_dim(_freqs_for_scale(min(scale, NUM_SCALES - 1)))
    y_t = multi_scale_encode_lanes(x, scale=scale, distances=distances,
                                   tile_n=tile_n, out_dtype=out_dtype)
    # TODO(synk): a fused downstream first-layer matmul should consume the
    # lane-dense [active_rows, N] result directly on the MXU inside the same
    # kernel, avoiding this transpose + zero-pad HBM round trip entirely.
    y = jnp.transpose(y_t)                                     # [N, active_rows]
    pad = full - y.shape[1]
    if pad > 0:
        y = jnp.pad(y, ((0, 0), (0, pad)))
    return y


# ---- pure-JAX reference (mirrors the PyTorch code) ---------------------------
def _ref_encode_scale(x, scale: int):
    scale = min(scale, NUM_SCALES - 1)
    nf = _freqs_for_scale(scale)
    cf = _current_freqs(nf)
    bands = _freq_bands(nf)
    pieces = [x] if INCLUDE_INPUT else []
    for i in range(nf):
        if i < cf:
            pieces.append(jnp.sin(x * bands[i]))
            pieces.append(jnp.cos(x * bands[i]))
        else:
            pieces.append(jnp.zeros_like(x))
            pieces.append(jnp.zeros_like(x))
    return jnp.concatenate(pieces, axis=-1)


def _ref_adaptive(x, distances):
    enc_dims = [_encoder_out_dim(_freqs_for_scale(s)) for s in range(NUM_SCALES)]
    max_out_dim = max(enc_dims)
    thresholds = [100.0, 50.0, 25.0, 10.0]
    n = x.shape[0]
    encoded = jnp.zeros((n, max_out_dim), x.dtype)
    d = distances
    masks = [
        d >= thresholds[0],
        (d < thresholds[0]) & (d >= thresholds[1]),
        (d < thresholds[1]) & (d >= thresholds[2]),
        (d < thresholds[2]) & (d >= thresholds[3]),
    ]
    for s, m in enumerate(masks):
        e = _ref_encode_scale(x, s)
        pad = max_out_dim - e.shape[1]
        if pad > 0:
            e = jnp.concatenate([e, jnp.zeros((n, pad), x.dtype)], axis=1)
        encoded = jnp.where(m[:, None], e, encoded)
    closest = d < thresholds[-1]
    e = _ref_encode_scale(x, NUM_SCALES - 1)
    encoded = jnp.where(closest[:, None], e, encoded)
    return encoded


# ---- demo --------------------------------------------------------------------
if __name__ == "__main__":
    key = jax.random.PRNGKey(0)
    kx, kd = jax.random.split(key)
    N = 256
    x = jax.random.normal(kx, (N, INPUT_DIM), dtype=jnp.float32) * 2.0
    distances = jax.random.uniform(kd, (N,), dtype=jnp.float32, minval=0.0, maxval=150.0)

    # scale-selected forward (scale=1 -> num_freqs_max=6, out_dim=39);
    # small tile_n to exercise a multi-step grid.
    out_scale = jax.block_until_ready(multi_scale_encode(x, scale=1, tile_n=128))
    ref_scale = _ref_encode_scale(x, 1)
    assert out_scale.shape == ref_scale.shape
    assert jnp.allclose(out_scale, ref_scale, atol=1e-5, rtol=1e-5)

    # adaptive distance-based forward (out_dim=63), default (large, clamped) tile.
    out_adapt = jax.block_until_ready(multi_scale_encode(x, distances=distances))
    ref_adapt = _ref_adaptive(x, distances)
    assert out_adapt.shape == ref_adapt.shape
    assert jnp.allclose(out_adapt, ref_adapt, atol=1e-5, rtol=1e-5)

    # lane-dense variant: only the active rows are produced; the dropped tail of
    # the reference is structurally zero.
    nf2 = _freqs_for_scale(2)
    act2 = _active_rows(_current_freqs(nf2))
    out_lanes = jax.block_until_ready(multi_scale_encode_lanes(x, scale=2))
    ref2 = _ref_encode_scale(x, 2)
    assert out_lanes.shape == (act2, N)
    assert jnp.allclose(out_lanes, ref2[:, :act2].T, atol=1e-5, rtol=1e-5)
    assert not bool(jnp.any(ref2[:, act2:] != 0.0))

    # lane-dense variant padded to the module output dim
    out_lanes_pad = jax.block_until_ready(
        multi_scale_encode_lanes(x, scale=1, pad_to_output_dim=True))
    assert jnp.allclose(out_lanes_pad, ref_scale.T, atol=1e-5, rtol=1e-5)

    # bf16 output path (f32 math, bf16 store): halves HBM writeback.
    out_bf16 = jax.block_until_ready(
        multi_scale_encode(x, scale=0, out_dtype=jnp.bfloat16))
    assert out_bf16.dtype == jnp.bfloat16
    ref0 = _ref_encode_scale(x, 0)
    assert jnp.allclose(out_bf16.astype(jnp.float32), ref0, atol=4e-2, rtol=2e-2)

    print("KERNEL_OK")
</pallas_src>

<mosaic_0001>
module attributes {stable_mosaic.version = 11 : i64} {
  func.func @kernel(%arg0: i32, %arg1: memref<3x128xf32, #tpu.memory_space<vmem>>, %arg2: memref<27x128xf32, #tpu.memory_space<vmem>>) attributes {dimension_semantics = [#tpu.dimension_semantics<parallel>], iteration_bounds = array<i64: 2>, scalar_prefetch = 0 : i64, scratch_operands = 0 : i64, tpu.core_type = #tpu.core_type<tc>, window_params = [{transform_indices = @transform_0, window_bounds = array<i64: 3, 128>}, {transform_indices = @transform_1, window_bounds = array<i64: 27, 128>}]} {
    %c0 = arith.constant 0 : index
    %c0_0 = arith.constant 0 : index
    %0 = vector.load %arg1[%c0, %c0_0] : memref<3x128xf32, #tpu.memory_space<vmem>>, vector<3x128xf32>
    %c0_1 = arith.constant 0 : index
    %c0_2 = arith.constant 0 : index
    %1 = vector.load %arg2[%c0_1, %c0_2] : memref<27x128xf32, #tpu.memory_space<vmem>>, vector<3x128xf32>
    tpu.vector_store %arg2[%c0_1, %c0_2], %0 {strides = array<i32>} : memref<27x128xf32, #tpu.memory_space<vmem>>, vector<3x128xf32>,
    %cst = arith.constant 1.000000e+00 : f32
    %2 = vector.broadcast %cst : f32 to vector<3x128xf32>
    %3 = arith.mulf %0, %2 : vector<3x128xf32>
    %cst_3 = arith.constant 2.000000e+00 : f32
    %4 = vector.broadcast %cst_3 : f32 to vector<3x128xf32>
    %5 = arith.mulf %0, %4 : vector<3x128xf32>
    %cst_4 = arith.constant 4.000000e+00 : f32
    %6 = vector.broadcast %cst_4 : f32 to vector<3x128xf32>
    %7 = arith.mulf %0, %6 : vector<3x128xf32>
    %cst_5 = arith.constant 8.000000e+00 : f32
    %8 = vector.broadcast %cst_5 : f32 to vector<3x128xf32>
    %9 = arith.mulf %0, %8 : vector<3x128xf32>
    %10 = tpu.concatenate %3, %5, %7, %9 in 0 : vector<3x128xf32>, vector<3x128xf32>, vector<3x128xf32>, vector<3x128xf32> -> vector<12x128xf32>
    %11 = math.sin %10 : vector<12x128xf32>
    %12 = math.cos %10 : vector<12x128xf32>
    %13 = vector.extract_strided_slice %11 {offsets = [0, 0], sizes = [3, 128], strides = [1, 1]} : vector<12x128xf32> to vector<3x128xf32>
    %c3 = arith.constant 3 : index
    %c0_6 = arith.constant 0 : index
    %14 = vector.load %arg2[%c3, %c0_6] : memref<27x128xf32, #tpu.memory_space<vmem>>, vector<3x128xf32>
    tpu.vector_store %arg2[%c3, %c0_6], %13 {strides = array<i32>} : memref<27x128xf32, #tpu.memory_space<vmem>>, vector<3x128xf32>,
    %15 = vector.extract_strided_slice %12 {offsets = [0, 0], sizes = [3, 128], strides = [1, 1]} : vector<12x128xf32> to vector<3x128xf32>
    %c6 = arith.constant 6 : index
    %c0_7 = arith.constant 0 : index
    %16 = vector.load %arg2[%c6, %c0_7] : memref<27x128xf32, #tpu.memory_space<vmem>>, vector<3x128xf32>
    tpu.vector_store %arg2[%c6, %c0_7], %15 {strides = array<i32>} : memref<27x128xf32, #tpu.memory_space<vmem>>, vector<3x128xf32>,
    %17 = vector.extract_strided_slice %11 {offsets = [3, 0], sizes = [3, 128], strides = [1, 1]} : vector<12x128xf32> to vector<3x128xf32>
    %c9 = arith.constant 9 : index
    %c0_8 = arith.constant 0 : index
    %18 = vector.load %arg2[%c9, %c0_8] : memref<27x128xf32, #tpu.memory_space<vmem>>, vector<3x128xf32>
    tpu.vector_store %arg2[%c9, %c0_8], %17 {strides = array<i32>} : memref<27x128xf32, #tpu.memory_space<vmem>>, vector<3x128xf32>,
    %19 = vector.extract_strided_slice %12 {offsets = [3, 0], sizes = [3, 128], strides = [1, 1]} : vector<12x128xf32> to vector<3x128xf32>
    %c12 = arith.constant 12 : index
    %c0_9 = arith.constant 0 : index
    %20 = vector.load %arg2[%c12, %c0_9] : memref<27x128xf32, #tpu.memory_space<vmem>>, vector<3x128xf32>
    tpu.vector_store %arg2[%c12, %c0_9], %19 {strides = array<i32>} : memref<27x128xf32, #tpu.memory_space<vmem>>, vector<3x128xf32>,
    %21 = vector.extract_strided_slice %11 {offsets = [6, 0], sizes = [3, 128], strides = [1, 1]} : vector<12x128xf32> to vector<3x128xf32>
    %c15 = arith.constant 15 : index
    %c0_10 = arith.constant 0 : index
    %22 = vector.load %arg2[%c15, %c0_10] : memref<27x128xf32, #tpu.memory_space<vmem>>, vector<3x128xf32>
    tpu.vector_store %arg2[%c15, %c0_10], %21 {strides = array<i32>} : memref<27x128xf32, #tpu.memory_space<vmem>>, vector<3x128xf32>,
    %23 = vector.extract_strided_slice %12 {offsets = [6, 0], sizes = [3, 128], strides = [1, 1]} : vector<12x128xf32> to vector<3x128xf32>
    %c18 = arith.constant 18 : index
    %c0_11 = arith.constant 0 : index
    %24 = vector.load %arg2[%c18, %c0_11] : memref<27x128xf32, #tpu.memory_space<vmem>>, vector<3x128xf32>
    tpu.vector_store %arg2[%c18, %c0_11], %23 {strides = array<i32>} : memref<27x128xf32, #tpu.memory_space<vmem>>, vector<3x128xf32>,
    %25 = vector.extract_strided_slice %11 {offsets = [9, 0], sizes = [3, 128], strides = [1, 1]} : vector<12x128xf32> to vector<3x128xf32>
    %c21 = arith.constant 21 : index
    %c0_12 = arith.constant 0 : index
    %26 = vector.load %arg2[%c21, %c0_12] : memref<27x128xf32, #tpu.memory_space<vmem>>, vector<3x128xf32>
    tpu.vector_store %arg2[%c21, %c0_12], %25 {strides = array<i32>} : memref<27x128xf32, #tpu.memory_space<vmem>>, vector<3x128xf32>,
    %27 = vector.extract_strided_slice %12 {offsets = [9, 0], sizes = [3, 128], strides = [1, 1]} : vector<12x128xf32> to vector<3x128xf32>
    %c24 = arith.constant 24 : index
    %c0_13 = arith.constant 0 : index
    %28 = vector.load %arg2[%c24, %c0_13] : memref<27x128xf32, #tpu.memory_space<vmem>>, vector<3x128xf32>
    tpu.vector_store %arg2[%c24, %c0_13], %27 {strides = array<i32>} : memref<27x128xf32, #tpu.memory_space<vmem>>, vector<3x128xf32>,
    return
  }
  func.func @transform_0(%arg0: i32) -> (i32, i32) {
    %c0_i32 = arith.constant 0 : i32
    %c0_i32_0 = arith.constant 0 : i32
    return %c0_i32, %arg0 : i32, i32
  }
  func.func @transform_1(%arg0: i32) -> (i32, i32) {
    %c0_i32 = arith.constant 0 : i32
    %c0_i32_0 = arith.constant 0 : i32
    return %c0_i32, %arg0 : i32, i32
  }
}

</mosaic_0001>

<bundles_post_ra>
// kernel: tpu_custom_call.1
= control target key start
LH: loop header
LB: loop body
LE: loop exit
PB: predicated region body
PF: predicated region fallthrough
CT: control target
= control target key end

     0   :  { %6 = vsyncpa [#allocation3], 0  ;;  %s1372_s0 = inlined_call_operand.hbm [shape: f32[3,256], index: 0, kind: input, shape index: {}]   ;;  %s1373_s1 = inlined_call_operand.hbm [shape: f32[27,256], index: 1, kind: output, shape index: {}]  }
   0x1   :  { %8 = vsyncpa [#allocation3 + $0x1], 0 }
   0x2   :  { %9 = vsyncpa [#allocation4], 0 }
   0x3   :  { %11 = vsyncpa [#allocation4 + $0x1], 0  ;;  %s1068_s6 = smov 0   ;;  %s1070_s7 = smov 0  }
   0x4   :  { %s1072_s8 = smov 0   ;;  %s1074_s9 = smov 0  }
   0x5 LB: > { %s1089_s10 = sadd.s32 4294967295, %s1046_s9   ;;  %s870_s11 = sadd.s32 4294967294, %s1046_s9   ;;  %s1046_s9 = sphi %s1074_s9, %s1385_s9   ;;  %s1042_s8 = sphi %s1072_s8, %s1384_s8   ;;  %s1038_s7 = sphi %s1070_s7, %s1383_s7   ;;  %s1034_s6 = sphi %s1068_s6, %s1382_s6  }
   0x6   : > { %s1093_s12 = sadd.s32 1, %s1046_s9   ;;  %s24_s13 = sadd.s32 1, %s1042_s8 }
   0x7   : > { %s21_s14 = ssub.s32 %s1046_s9, %s1093_s12  ;;  %p31_p0 = scmp.ne.s32.totalorder %s1042_s8, %s1038_s7 }
   0x8   : > { %p22_p1 = scmp.eq.s32.totalorder %s21_s14, 0  ;;  %p32_p2 = scmp.eq.s32.totalorder %s1046_s9, 0 }
   0x9   : > { %p37_p3 = scmp.ne.s32.totalorder %s1038_s7, %s1034_s6  ;;  %p38_p4 = scmp.eq.s32.totalorder %s1089_s10, 0 }
   0xa   : > { %s1105_s15 = scalar_select %p22_p1, %s1042_s8, %s24_s13  }
   0xb   : > { %p1107_p5 = por %p32_p2, %p31_p0  ;;  %p1111_p6 = por %p38_p4, %p37_p3 }
   0xc   : > { %p61_p7 = scmp.eq.s32.totalorder %s1089_s10, 1  ;;  %p67_p8 = scmp.eq.s32.totalorder %s870_s11, 1 }
   0xd   : > { %p906_p10 = scmp.lt.s32.totalorder %s1046_s9, 2  ;;  %s87_s20 = sand.u32 1, %s1042_s8  }
   0xe   : > { %p1118_p11 = por %p61_p7, %p31_p0  ;;  %p1122_p12 = por %p67_p8, %p37_p3 }
   0xf   : > { %s874_s21 = sshll.u32 %s1046_s9, 2  ;;  %s873_s22 = sshll.u32 %s87_s20, 2 }
  0x10   : > { %s95_s25 = scalar_lea.hbm %s1372_s0, %s874_s21  ;;  %s91_s27 = scalar_lea.vmem [#allocation2], %s873_s22 }
  0x11   : > { %s97_s26 = sshll.u32 %s95_s25, 4  ;;  %s99_s28 = sshll.u32 %s91_s27, 4  ;;  %s98_s26 = int_to_ptr.hbm [resolvable:$true] %s97_s26  ;;  %s100_s28 = int_to_ptr.vmem [resolvable:$true] %s99_s28 }
  0x12   : > { %p1133_p13 = pnand %p906_p10, %p1107_p5  ;;  %p875_p0 = scmp.ge.s32.totalorder %s1046_s9, 1 }
  0x13   : > { %p104_p1 = scmp.lt.s32.totalorder %s1046_s9, 3  ;;  %s88_s30 = scalar_lea.sflag [#allocation3], %s87_s20 }
  0x14   : > { %s950_s2 = sshra.s32 %s98_s26, 4  ;;  %p954_p3 = pneg %p1133_p13  ;;  %s951_s2 = int_to_ptr.hbm [resolvable:$true] %s950_s2 }
  0x15   : > { %s952_s3 = scalar_lea.hbm %s951_s2, 4  ;;  %s957_s11 = scalar_lea.hbm %s1372_s0, 8 }
  0x16   : > { %p953_p2 = scmp.ne.s32.totalorder %s951_s2, %s952_s3  ;;  %p958_p5 = scmp.lt.s32.totalorder %s951_s2, %s1372_s0 }
  0x17   : > { %p959_p8 = scmp.lt.s32.totalorder %s957_s11, %s952_s3 }
  0x18   : > { %p955_p4 = pnand %p954_p3, %p953_p2 }
  0x19   : > { %p960_p10 = por %p959_p8, %p958_p5 }
  0x1a   : > { %p956_p7 = pneg %p955_p4 }
  0x1c   : > { %p961_p9 = pnand %p960_p10, %p956_p7 }
  0x1e   : > { %964 = shalt.err (!%p961_p9)
}
  0x1f   : > { %901 = dma.hbm_to_vmem [thread:$0]  (!%p1133_p13), %s98_s26, 64, %s100_s28, %s88_s30  }
  0x20   : > { %p105_p2 = pnand %p875_p0, %p104_p1 }
  0x21   : > { %s1154_s16 = sand.u32 (!%p105_p2), 1, %s1038_s7  }
  0x22   : > { %108 = sbr.rel (%p105_p2) target bundleno = 168 (0xa8), region = 24  ;;  %s876_s20 = sshll.u32 (!%p105_p2), %s1154_s16, 2 }
  0x23   : > { %s111_s21 = scalar_lea.sflag (!%p105_p2), [#allocation3], %s1154_s16  ;;  %s114_s22 = scalar_lea.vmem (!%p105_p2), [#allocation2], %s876_s20 }
  0x27   : > { %1025 = dma.done.wait (%p1111_p6), %s111_s21, 64  }
  0x28   : > { %1027 = vsyncadd (%p1111_p6), %s111_s21, 4294967232  ;;  %s877_s23 = sshll.u32 %s1154_s16, 5  ;;  %v134_v0 = vld [vmem:[%s114_s22] sm:$0x7]  ;;  %vm148_vm0 = vcmask 1042432   ;;  %vm152_vm1 = vcmask 1040384  }
  0x29   : > { %s1163_s24 = scalar_lea.vmem [#allocation5], %s877_s23  ;;  %v136_v1 = vmul.f32 2.0, %v134_v0  ;;  %v137_v2 = vmul.f32 4.0, %v134_v0  ;;  %v138_v3 = vmul.f32 8.0, %v134_v0  ;;  %vm150_vm2 = vcmask 1045504   ;;  %s891_s17 = sshll.u32 %s1089_s10, 3 }
  0x2a   : > { %135 = vst [vmem:[%s1163_s24] sm:$0x7] %v134_v0  ;;  %v1048_v36 = vmov 683565275   ;;  %v1049_v38 = vmov 2475754826   ;;  %s793_s27 = scalar_lea.hbm %s1373_s1, %s891_s17  ;;  %s794_s10 = sshll.u32 %s1163_s24, 4  ;;  %s795_s10 = int_to_ptr.vmem [resolvable:$true] %s794_s10 }
  0x2b   : > { %v140_v4 = vrot.slane %v136_v1, 5  ;;  %v143_v5 = vrot.slane %v137_v2, 2  ;;  %v146_v6 = vrot.slane %v138_v3, 7  ;;  %v1050_v40 = vmov 2131351028   ;;  %s796_s28 = sshll.u32 %s793_s27, 4  ;;  %s797_s28 = int_to_ptr.hbm [resolvable:$true] %s796_s28 }
  0x2c   : > { %v1051_v42 = vmov 2102212464   ;;  %v1052_v44 = vmov 920167782   ;;  %v1053_v54 = vmov 1326507024  }
  0x2d   : > { %v149_v7 = vsel %vm148_vm0, %v134_v0, %v140_v4  ;;  %v1166_v8 = vsel %vm152_vm1, %v143_v5, %v146_v6  ;;  %s783_s29 = scalar_lea.sflag [#allocation4], %s1154_s16  ;;  %s994_s30 = sshra.s32 %s797_s28, 4  ;;  %s995_s30 = int_to_ptr.hbm [resolvable:$true] %s994_s30 }
  0x2e   : > { %v1168_v9 = vsel %vm150_vm2, %v149_v7, %v143_v5  ;;  %v309_v10 = vand.u32 2147483647, %v1166_v8  ;;  %v312_v11 = vand.u32 2139095040, %v1166_v8  ;;  %s996_s2 = scalar_lea.hbm %s995_s30, 32  ;;  %s1000_s5 = scalar_lea.hbm %s1373_s1, 64 }
  0x2f   : > { %v154_v12 = vand.u32 2147483647, %v1168_v9  ;;  %v157_v13 = vand.u32 2139095040, %v1168_v9  ;;  %p997_p6 = scmp.ne.s32.totalorder %s995_s30, %s996_s2  ;;  %p1001_p0 = scmp.lt.s32.totalorder %s995_s30, %s1373_s1 }
  0x30   : > { %v313_v14 = vshrl.u32 %v312_v11, 23  ;;  %v316_v15 = vand.u32 8388607, %v309_v10  ;;  %p1002_p1 = scmp.lt.s32.totalorder %s1000_s5, %s996_s2 }
  0x31   : > { %v158_v16 = vshrl.u32 %v157_v13, 23  ;;  %v161_v17 = vand.u32 8388607, %v154_v12  ;;  %p998_p9 = pnand %p997_p6, %p1118_p11 }
  0x32   : > { %v881_v18 = vadd.s32 4294967169, %v313_v14  ;;  %v317_v19 = vor.u32 8388608, %v316_v15  ;;  %p1003_p3 = por %p1002_p1, %p1001_p0 }
  0x33   : > { %v878_v20 = vadd.s32 4294967169, %v158_v16  ;;  %v162_v21 = vor.u32 8388608, %v161_v17  ;;  %p999_p13 = pneg %p998_p9 }
  0x34   : > { %v319_v22 = vadd.s32 1, %v881_v18  ;;  %v1178_v24 = vshll.u32 %v317_v19, 8 }
  0x35   : > { %v164_v23 = vadd.s32 1, %v878_v20  ;;  %v1180_v25 = vshll.u32 %v162_v21, 8  ;;  %p1004_p4 = pnand %p1003_p3, %p999_p13 }
  0x36   : > { %vm320_vm3 = vcmp.gt.s32.totalorder %v319_v22, 0  ;;  %v1185_v30 = vand.u32 65535, %v1178_v24  ;;  %v1194_v34 = vshrl.u32 %v1178_v24, 16 }
  0x37   : > { %vm165_vm4 = vcmp.gt.s32.totalorder %v164_v23, 0  ;;  %v321_v26 = vsel %vm320_vm3, %v319_v22, 0  ;;  %v203_v32 = vand.u32 65535, %v1180_v25  ;;  %v1191_v33 = vshrl.u32 %v1180_v25, 16 }
  0x38   : > { %v166_v27 = vsel %vm165_vm4, %v164_v23, 0  ;;  %v1182_v28 = vand.u32 31, %v321_v26  ;;  %v1217_v11 = vshrl.u32 %v321_v26, 5 }
  0x39   : > { %v168_v29 = vand.u32 31, %v166_v27  ;;  %v1187_v31 = vshrl.u32 %v166_v27, 5 }
  0x3a   : > { %v1198_v46 = vsub.s32 32, %v1182_v28  ;;  %v326_v47 = vshll.u32 %v1048_v36, %v1182_v28  ;;  %v329_v51 = vshll.u32 %v1049_v38, %v1182_v28  ;;  %v332_v61 = vshll.u32 %v1050_v40, %v1182_v28 }
  0x3b   : > { %v169_v35 = vsub.s32 32, %v168_v29  ;;  %v171_v37 = vshll.u32 %v1048_v36, %v168_v29  ;;  %v174_v39 = vshll.u32 %v1049_v38, %v168_v29  ;;  %v177_v41 = vshll.u32 %v1050_v40, %v168_v29 }
  0x3c   : > { %v180_v43 = vshll.u32 %v1051_v42, %v168_v29  ;;  %v183_v45 = vshll.u32 %v1052_v44, %v168_v29  ;;  %vm186_vm5 = vcmp.lt.s32.totalorder %v1187_v31, 1  ;;  %vm189_vm6 = vcmp.lt.s32.totalorder %v1187_v31, 4 }
  0x3d   : > { %v172_v48 = vshrl.u32 %v1049_v38, %v169_v35  ;;  %v175_v49 = vshrl.u32 %v1050_v40, %v169_v35  ;;  %v178_v50 = vshrl.u32 %v1051_v42, %v169_v35  ;;  %v170_v52 = vshrl.u32 %v1048_v36, %v169_v35 }
  0x3e   : > { %v181_v53 = vshrl.u32 %v1052_v44, %v169_v35  ;;  %v184_v55 = vshrl.u32 %v1053_v54, %v169_v35  ;;  %vm188_vm7 = vcmp.lt.s32.totalorder %v1187_v31, 3  ;;  %vm187_vm8 = vcmp.lt.s32.totalorder %v1187_v31, 2 }
  0x3f   : > { %v173_v56 = vor.u32 %v172_v48, %v171_v37  ;;  %v176_v57 = vor.u32 %v175_v49, %v174_v39  ;;  %v179_v58 = vor.u32 %v178_v50, %v177_v41  ;;  %v327_v3 = vshrl.u32 %v1049_v38, %v1198_v46 }
  0x40   : > { %v182_v59 = vor.u32 %v181_v53, %v180_v43  ;;  %v185_v60 = vor.u32 %v184_v55, %v183_v45  ;;  %v330_v4 = vshrl.u32 %v1050_v40, %v1198_v46  ;;  %v333_v16 = vshrl.u32 %v1051_v42, %v1198_v46 }
  0x41   : > { %v191_v62 = vsel %vm189_vm6, %v179_v58, 2102212464  ;;  %v194_v63 = vsel %vm186_vm5, %v173_v56, %v176_v57  ;;  %v198_v0 = vsel %vm186_vm5, %v176_v57, %v179_v58  ;;  %v190_v5 = vsel %vm186_vm5, %v170_v52, %v173_v56 }
  0x42   : > { %v195_v1 = vsel %vm189_vm6, %v182_v59, 920167782  ;;  %v199_v2 = vsel %vm189_vm6, %v185_v60, 1326507024  ;;  %v192_v13 = vsel %vm188_vm7, %v176_v57, %v191_v62  ;;  %v1224_v21 = vor.u32 %v327_v3, %v326_v47 }
  0x43   : > { %v196_v6 = vsel %vm188_vm7, %v179_v58, %v195_v1  ;;  %v200_v7 = vsel %vm188_vm7, %v182_v59, %v199_v2  ;;  %v1226_v22 = vor.u32 %v330_v4, %v329_v51  ;;  %v1228_v23 = vor.u32 %v333_v16, %v332_v61 }
  0x44   : > { %v197_v14 = vsel %vm187_vm8, %v194_v63, %v196_v6  ;;  %v201_v15 = vsel %vm187_vm8, %v198_v0, %v200_v7  ;;  %v335_v26 = vshll.u32 %v1051_v42, %v1182_v28  ;;  %v336_v37 = vshrl.u32 %v1052_v44, %v1198_v46 }
  0x45   : > { %v205_v17 = vand.u32 65535, %v201_v15  ;;  %v206_v18 = vshrl.u32 %v201_v15, 16  ;;  %v227_v19 = vand.u32 65535, %v197_v14  ;;  %v228_v20 = vshrl.u32 %v197_v14, 16 }
  0x46   : > { %v338_v41 = vshll.u32 %v1052_v44, %v1182_v28  ;;  %v339_v55 = vshrl.u32 %v1053_v54, %v1198_v46  ;;  %v337_v44 = vor.u32 %v336_v37, %v335_v26  ;;  %vm341_vm12 = vcmp.lt.s32.totalorder %v1217_v11, 1 }
  0x47   : > { %v207_v27 = vmul.u32 %v205_v17, %v203_v32  ;;  %v208_v29 = vmul.u32 %v206_v18, %v203_v32  ;;  %v209_v35 = vmul.u32 %v205_v17, %v1191_v33  ;;  %v229_v38 = vmul.u32 %v227_v19, %v203_v32 }
  0x48   : > { %v230_v39 = vmul.u32 %v228_v20, %v203_v32  ;;  %v231_v40 = vmul.u32 %v227_v19, %v1191_v33  ;;  %v210_v43 = vmul.u32 %v206_v18, %v1191_v33  ;;  %v232_v48 = vmul.u32 %v228_v20, %v1191_v33 }
  0x49   : > { %v211_v45 = vshll.u32 %v208_v29, 16  ;;  %v213_v47 = vshll.u32 %v209_v35, 16  ;;  %v212_v49 = vshrl.u32 %v208_v29, 16  ;;  %v214_v42 = vshrl.u32 %v209_v35, 16 }
  0x4a   : > { %v233_v50 = vshll.u32 %v230_v39, 16  ;;  %v235_v51 = vshll.u32 %v231_v40, 16  ;;  %v234_v53 = vshrl.u32 %v230_v39, 16  ;;  %v1054_v32 = vmov 0  }
  0x4b   : > { %vm215_vm9 = vc.u32 %v207_v27, %v211_v45  ;;  %v217_v52 = vadd.s32 %v211_v45, %v207_v27  ;;  %v340_v60 = vor.u32 %v339_v55, %v338_v41  ;;  %v236_v62 = vshrl.u32 %v231_v40, 16 }
  0x4c   : > { %v216_v56 = vsel %vm215_vm9, 1, %v1054_v32  ;;  %vm237_vm10 = vc.u32 %v229_v38, %v233_v50  ;;  %v239_v28 = vadd.s32 %v233_v50, %v229_v38  ;;  %vm343_vm14 = vcmp.lt.s32.totalorder %v1217_v11, 3 }
  0x4d   : > { %v218_v57 = vadd.s32 %v216_v56, %v210_v43  ;;  %vm219_vm11 = vc.u32 %v217_v52, %v213_v47  ;;  %v238_v58 = vsel %vm237_vm10, 1, %v1054_v32  ;;  %vm342_vm15 = vcmp.lt.s32.totalorder %v1217_v11, 2 }
  0x4e   : > { %v220_v33 = vsel %vm219_vm11, 1, %v1054_v32  ;;  %v240_v59 = vadd.s32 %v238_v58, %v232_v48  ;;  %vm241_vm13 = vc.u32 %v239_v28, %v235_v51  ;;  %vm344_vm0 = vcmp.lt.s32.totalorder %v1217_v11, 4 }
  0x4f   : > { %v222_v61 = vadd.s32 %v220_v33, %v218_v57  ;;  %v242_v54 = vsel %vm241_vm13, 1, %v1054_v32  ;;  %v349_v0 = vsel %vm341_vm12, %v1224_v21, %v1226_v22  ;;  %v1250_v2 = vadd.s32 %v239_v28, %v235_v51 }
  0x50   : > { %v244_v63 = vadd.s32 %v242_v54, %v240_v59  ;;  %v350_v3 = vsel %vm344_vm0, %v337_v44, 920167782  ;;  %v353_v4 = vsel %vm341_vm12, %v1226_v22, %v1228_v23  ;;  %v193_v6 = vsel %vm187_vm8, %v190_v5, %v192_v13 }
  0x51   : > { %v223_v1 = vadd.s32 %v222_v61, %v212_v49  ;;  %v351_v14 = vsel %vm343_vm14, %v1228_v23, %v350_v3  ;;  %v354_v15 = vsel %vm344_vm0, %v340_v60, 1326507024  ;;  %v247_v20 = vmul.u32 %v1180_v25, %v193_v6 }
  0x52   : > { %v245_v7 = vadd.s32 %v244_v63, %v234_v53  ;;  %v352_v17 = vsel %vm342_vm15, %v349_v0, %v351_v14  ;;  %v355_v18 = vsel %vm343_vm14, %v337_v44, %v354_v15  ;;  %v325_v50 = vshrl.u32 %v1048_v36, %v1198_v46 }
  0x53   : > { %v1265_v16 = vadd.s32 %v223_v1, %v214_v42  ;;  %v356_v31 = vsel %vm342_vm15, %v353_v4, %v355_v18  ;;  %v382_v5 = vand.u32 65535, %v352_v17  ;;  %v383_v13 = vshrl.u32 %v352_v17, 16 }
  0x54   : > { %v246_v19 = vadd.s32 %v245_v7, %v236_v62  ;;  %v360_v26 = vand.u32 65535, %v356_v31  ;;  %v361_v27 = vshrl.u32 %v356_v31, 16  ;;  %v346_v51 = vsel %vm344_vm0, %v1228_v23, 2102212464 }
  0x55   : > { %vm249_vm1 = vc.u32 %v1265_v16, %v1250_v2  ;;  %v384_v35 = vmul.u32 %v382_v5, %v1185_v30  ;;  %v385_v37 = vmul.u32 %v383_v13, %v1185_v30  ;;  %v386_v38 = vmul.u32 %v382_v5, %v1194_v34 }
  0x56   : > { %v250_v29 = vadd.s32 1, %v246_v19  ;;  %v362_v39 = vmul.u32 %v360_v26, %v1185_v30  ;;  %v363_v40 = vmul.u32 %v361_v27, %v1185_v30  ;;  %v364_v41 = vmul.u32 %v360_v26, %v1194_v34 }
  0x57   : > { %v365_v25 = vmul.u32 %v361_v27, %v1194_v34  ;;  %v388_v45 = vshll.u32 %v385_v37, 16  ;;  %v387_v42 = vmul.u32 %v383_v13, %v1194_v34  ;;  %v390_v52 = vshll.u32 %v386_v38, 16 }
  0x58   : > { %v251_v43 = vsel %vm249_vm1, %v250_v29, %v246_v19  ;;  %v366_v48 = vshll.u32 %v363_v40, 16  ;;  %v368_v49 = vshll.u32 %v364_v41, 16  ;;  %v367_v56 = vshrl.u32 %v363_v40, 16 }
  0x59   : > { %v252_v47 = vadd.s32 %v251_v43, %v247_v20  ;;  %vm392_vm2 = vc.u32 %v384_v35, %v388_v45  ;;  %v394_v44 = vadd.s32 %v388_v45, %v384_v35  ;;  %v345_v36 = vsel %vm341_vm12, %v325_v50, %v1224_v21 }
  0x5a   : > { %vm370_vm3 = vc.u32 %v362_v39, %v366_v48  ;;  %v372_v53 = vadd.s32 %v366_v48, %v362_v39  ;;  %v393_v55 = vsel %vm392_vm2, 1, %v1054_v32  ;;  %v347_v46 = vsel %vm343_vm14, %v1226_v22, %v346_v51 }
  0x5b   : > { %v253_v30 = vadd.s32 536870912, %v252_v47  ;;  %v371_v28 = vsel %vm370_vm3, 1, %v1054_v32  ;;  %v395_v58 = vadd.s32 %v393_v55, %v387_v42  ;;  %vm396_vm5 = vc.u32 %v394_v44, %v390_v52 }
  0x5c   : > { %v373_v34 = vadd.s32 %v371_v28, %v365_v25  ;;  %vm374_vm4 = vc.u32 %v372_v53, %v368_v49  ;;  %v369_v59 = vshrl.u32 %v364_v41, 16  ;;  %v389_v61 = vshrl.u32 %v385_v37, 16 }
  0x5d   : > { %v254_v57 = vshrl.u32 %v253_v30, 30  ;;  %v375_v23 = vsel %vm374_vm4, 1, %v1054_v32  ;;  %v397_v62 = vsel %vm396_vm5, 1, %v1054_v32  ;;  %v391_v0 = vshrl.u32 %v386_v38, 16 }
  0x5e   : > { %v377_v60 = vadd.s32 %v375_v23, %v373_v34  ;;  %v399_v1 = vadd.s32 %v397_v62, %v395_v58  ;;  %v348_v21 = vsel %vm342_vm15, %v345_v36, %v347_v46  ;;  %v398_v3 = vadd.s32 %v394_v44, %v390_v52 }
  0x5f   : > { %v255_v33 = vshll.u32 %v254_v57, 30  ;;  %v402_v17 = vmul.u32 %v1178_v24, %v348_v21  ;;  %v248_v31 = vadd.s32 %v1250_v2, %v1265_v16  ;;  %vm156_vm10 = vcmp.lt.s32.totalorder %v1168_v9, 0 }
  0x60   : > { %v378_v63 = vadd.s32 %v377_v60, %v367_v56  ;;  %v400_v6 = vadd.s32 %v399_v1, %v389_v61  ;;  %vm155_vm11 = vcmp.le.f32.partialorder %v154_v12, 0.7853982  ;;  %vm311_vm13 = vcmp.lt.s32.totalorder %v1166_v8, 0 }
  0x61   : > { %v256_v54 = vsub.s32 %v252_v47, %v255_v33  ;;  %v278_v47 = vsub.s32 4, %v254_v57  ;;  %vm1315_vm0 = vcmp.le.f32.partialorder %v309_v10, 0.7853982  ;;  %vm297_vm5 = vweird.f32 %v1168_v9 }
  0x62   : > { %v379_v22 = vadd.s32 %v378_v63, %v369_v59  ;;  %v401_v14 = vadd.s32 %v400_v6, %v391_v0 }
  0x63   : > { %vm257_vm6 = vcmp.lt.s32.totalorder %v256_v54, 0  ;;  %v258_v4 = vsub.s32 0, %v256_v54  ;;  %v279_v51 = vsel %vm156_vm10, %v278_v47, %v254_v57 }
  0x64   : > { %vm404_vm7 = vc.u32 %v379_v22, %v398_v3  ;;  %v405_v18 = vadd.s32 1, %v401_v14  ;;  %v403_v30 = vadd.s32 %v398_v3, %v379_v22  ;;  %v281_v34 = vsel %vm155_vm11, 0, %v279_v51 }
  0x65   : > { %v259_v7 = vsel %vm257_vm6, %v258_v4, %v256_v54  ;;  %v298_v59 = vadd.s32 3, %v281_v34  ;;  %v608_v3 = vand.u32 3, %v281_v34 }
  0x66   : > { %v260_v15 = vclz %v259_v7  ;;  %v406_v19 = vsel %vm404_vm7, %v405_v18, %v401_v14 }
  0x67   : > { %v407_v11 = vadd.s32 %v406_v19, %v402_v17  ;;  %v299_v21 = vand.u32 3, %v298_v59  ;;  %vm613_vm15 = vcmp.eq.s32.totalorder %v608_v3, 2  ;;  %vm609_vm3 = vcmp.lt.s32.totalorder %v608_v3, 2 }
  0x68   : > { %v879_v32 = vadd.s32 4294967294, %v260_v15  ;;  %vm610_vm4 = vcmp.eq.s32.totalorder %v608_v3, 0 }
  0x69   : > { %v408_v27 = vadd.s32 536870912, %v407_v11  ;;  %vm304_vm14 = vcmp.eq.s32.totalorder %v299_v21, 2  ;;  %vm300_vm1 = vcmp.lt.s32.totalorder %v299_v21, 2  ;;  %vm301_vm2 = vcmp.eq.s32.totalorder %v299_v21, 0 }
  0x6a   : > { %vm880_vm8 = vcmp.lt.s32.totalorder %v879_v32, 0 }
  0x6b   : > { %v263_v5 = vsel %vm880_vm8, 0, %v879_v32  ;;  %v1304_v37 = vshrl.u32 %v408_v27, 30 }
  0x6c   : > { %v264_v13 = vsub.s32 32, %v263_v5  ;;  %v265_v20 = vshll.u32 %v256_v54, %v263_v5  ;;  %v268_v26 = vsub.s32 4294967266, %v263_v5 }
  0x6d   : > { %v410_v39 = vshll.u32 %v1304_v37, 30  ;;  %v433_v14 = vsub.s32 4, %v1304_v37 }
  0x6e   : > { %v266_v29 = vshrl.u32 %v248_v31, %v264_v13  ;;  %v269_v35 = vadd.s32 127, %v268_v26 }
  0x6f   : > { %v411_v43 = vsub.s32 %v407_v11, %v410_v39  ;;  %v434_v5 = vsel %vm311_vm13, %v433_v14, %v1304_v37 }
  0x70   : > { %v267_v38 = vor.u32 %v266_v29, %v265_v20  ;;  %v270_v24 = vshll.u32 %v269_v35, 23 }
  0x71   : > { %vm412_vm9 = vcmp.lt.s32.totalorder %v411_v43, 0  ;;  %v413_v2 = vsub.s32 0, %v411_v43 }
  0x72   : > { %v271_v40 = vor.u32 4788187, %v270_v24  ;;  %v274_v41 = vcvt.s32.f32 %v267_v38  ;;  %v436_v38 = vsel %vm1315_vm0, 0, %v434_v5 }
  0x73   : > { %v414_v45 = vsel %vm412_vm9, %v413_v2, %v411_v43  ;;  %v453_v2 = vadd.s32 3, %v436_v38 }
  0x74   : > { %v272_v25 = vand.u32 2147483647, %v271_v40  ;;  %v415_v48 = vclz %v414_v45 }
  0x76   : > { %v275_v16 = vmul.f32 %v274_v41, %v272_v25  ;;  %v882_v42 = vadd.s32 4294967294, %v415_v48 }
  0x78   : > { %v276_v49 = vxor.u32 2147483648, %v275_v16  ;;  %vm883_vm12 = vcmp.lt.s32.totalorder %v882_v42, 0 }
  0x79   : > { %v418_v55 = vsel %vm883_vm12, 0, %v882_v42  ;;  %v762_v42 = vand.u32 3, %v436_v38  ;;  %vm452_vm12 = vweird.f32 %v1166_v8 }
  0x7a   : > { %v277_v50 = vsel %vm156_vm10, %v276_v49, %v275_v16  ;;  %v419_v56 = vsub.s32 32, %v418_v55  ;;  %v420_v28 = vshll.u32 %v411_v43, %v418_v55  ;;  %v423_v44 = vsub.s32 4294967266, %v418_v55 }
  0x7b   : > { %v280_v52 = vsel %vm155_vm11, %v1168_v9, %v277_v50  ;;  %v454_v49 = vand.u32 3, %v453_v2  ;;  %vm767_vm7 = vcmp.eq.s32.totalorder %v762_v42, 2  ;;  %vm764_vm10 = vcmp.eq.s32.totalorder %v762_v42, 0 }
  0x7c   : > { %v282_v53 = vmul.f32 %v280_v52, %v280_v52  ;;  %v421_v46 = vshrl.u32 %v403_v30, %v419_v56  ;;  %v424_v23 = vadd.s32 127, %v423_v44  ;;  %vm763_vm11 = vcmp.lt.s32.totalorder %v762_v42, 2 }
  0x7d   : > { %vm459_vm6 = vcmp.eq.s32.totalorder %v454_v49, 2  ;;  %vm455_vm8 = vcmp.lt.s32.totalorder %v454_v49, 2  ;;  %vm456_vm9 = vcmp.eq.s32.totalorder %v454_v49, 0 }
  0x7e   : > { %v283_v58 = vmul.f32 -0.001358992, %v282_v53  ;;  %v290_v36 = vmul.f32 -0.00019511016, %v282_v53  ;;  %v422_v60 = vor.u32 %v421_v46, %v420_v28  ;;  %v425_v61 = vshll.u32 %v424_v23, 23 }
  0x80   : > { %v284_v33 = vadd.f32 0.041655596, %v283_v58  ;;  %v291_v12 = vadd.f32 0.008332121, %v290_v36  ;;  %v426_v54 = vor.u32 4788187, %v425_v61  ;;  %v429_v63 = vcvt.s32.f32 %v422_v60 }
  0x82   : > { %v285_v57 = vmul.f32 %v284_v33, %v282_v53  ;;  %v292_v62 = vmul.f32 %v291_v12, %v282_v53  ;;  %v427_v4 = vand.u32 2147483647, %v426_v54 }
  0x84   : > { %v286_v0 = vadd.f32 -0.4999988, %v285_v57  ;;  %v293_v1 = vadd.f32 -0.16666654, %v292_v62  ;;  %v430_v7 = vmul.f32 %v429_v63, %v427_v4 }
  0x86   : > { %v287_v22 = vmul.f32 %v286_v0, %v282_v53  ;;  %v294_v6 = vmul.f32 %v293_v1, %v282_v53  ;;  %v431_v32 = vxor.u32 2147483648, %v430_v7 }
  0x88   : > { %v288_v15 = vadd.f32 1.0, %v287_v22  ;;  %v295_v17 = vadd.f32 1.0, %v294_v6  ;;  %v432_v11 = vsel %vm311_vm13, %v431_v32, %v430_v7 }
  0x89   : > { %v435_v10 = vsel %vm1315_vm0, %v1166_v8, %v432_v11 }
  0x8a   : > { %v296_v19 = vmul.f32 %v295_v17, %v280_v52  ;;  %v305_v31 = vxor.u32 2147483648, %v288_v15  ;;  %v437_v27 = vmul.f32 %v435_v10, %v435_v10 }
  0x8c   : > { %v302_v13 = vxor.u32 2147483648, %v296_v19  ;;  %v306_v20 = vsel %vm304_vm14, %v305_v31, %v296_v19  ;;  %v615_v26 = vsel %vm613_vm15, %v305_v31, %v296_v19  ;;  %v438_v39 = vmul.f32 -0.001358992, %v437_v27 }
  0x8d   : > { %v445_v40 = vmul.f32 -0.00019511016, %v437_v27 }
  0x8e   : > { %v303_v29 = vsel %vm301_vm2, %v288_v15, %v302_v13  ;;  %v612_v35 = vsel %vm610_vm4, %v288_v15, %v302_v13  ;;  %v439_v25 = vadd.f32 0.041655596, %v438_v39 }
  0x8f   : > { %v307_v37 = vsel %vm300_vm1, %v303_v29, %v306_v20  ;;  %v616_v24 = vsel %vm609_vm3, %v612_v35, %v615_v26  ;;  %v446_v9 = vadd.f32 0.008332121, %v445_v40 }
  0x90   : > { %v308_v41 = vsel %vm297_vm5, nan, %v307_v37  ;;  %v617_v43 = vsel %vm297_vm5, nan, %v616_v24  ;;  %v440_v16 = vmul.f32 %v439_v25, %v437_v27 }
  0x91   : > { %772 = vst [vmem:[%s1163_s24 + $0x3] sm:$0x7] %v308_v41  ;;  %v447_v45 = vmul.f32 %v446_v9, %v437_v27 }
  0x92   : > { %774 = vst [vmem:[%s1163_s24 + $0x6] sm:$0x38] %v308_v41  ;;  %v441_v47 = vadd.f32 -0.4999988, %v440_v16 }
  0x93   : > { %776 = vst [vmem:[%s1163_s24 + $0x9] sm:$0xc0] %v308_v41  ;;  %v448_v48 = vadd.f32 -0.16666654, %v447_v45 }
  0x94   : > { %773 = vst [vmem:[%s1163_s24 + $0x6] sm:$0x7] %v617_v43  ;;  %v442_v50 = vmul.f32 %v441_v47, %v437_v27 }
  0x95   : > { %775 = vst [vmem:[%s1163_s24 + $0x9] sm:$0x38] %v617_v43  ;;  %v449_v51 = vmul.f32 %v448_v48, %v437_v27 }
  0x96   : > { %778 = vst [vmem:[%s1163_s24 + $0xc] sm:$0xc0] %v617_v43  ;;  %v443_v52 = vadd.f32 1.0, %v442_v50 }
  0x97   : > { %v450_v30 = vadd.f32 1.0, %v449_v51 }
  0x98   : > { %v460_v55 = vxor.u32 2147483648, %v443_v52 }
  0x99   : > { %v451_v53 = vmul.f32 %v450_v30, %v435_v10 }
  0x9b   : > { %v457_v56 = vxor.u32 2147483648, %v451_v53  ;;  %v461_v28 = vsel %vm459_vm6, %v460_v55, %v451_v53  ;;  %v769_v44 = vsel %vm767_vm7, %v460_v55, %v451_v53 }
  0x9d   : > { %v458_v34 = vsel %vm456_vm9, %v443_v52, %v457_v56  ;;  %v766_v58 = vsel %vm764_vm10, %v443_v52, %v457_v56 }
  0x9e   : > { %v462_v36 = vsel %vm455_vm8, %v458_v34, %v461_v28  ;;  %v770_v46 = vsel %vm763_vm11, %v766_v58, %v769_v44 }
  0x9f   : > { %v463_v23 = vsel %vm452_vm12, nan, %v462_v36  ;;  %v771_v33 = vsel %vm452_vm12, nan, %v770_v46 }
  0xa0   : > { %777 = vst [vmem:[%s1163_s24 + $0x11] sm:$0x1] %v463_v23 }
  0xa1   : > { %780 = vst [vmem:[%s1163_s24 + $0x14] sm:$0xe] %v463_v23 }
  0xa2   : > { %779 = vst [vmem:[%s1163_s24 + $0x14] sm:$0x1] %v771_v33 }
  0xa3   : > { %781 = vst [vmem:[%s1163_s24 + $0x17] sm:$0xe] %v771_v33 }
  0xa4   : > { %1007 = shalt.err (!%p1004_p4)
}
  0xa5   : > { %s1055_s14 = smov 128   ;;  %s1056_s16 = smov 256  }
  0xa6   : > { %s1057_s20 = smov 8  }
  0xa7   : > { %896 = dma.vmem_to_hbm [thread:$0]  (%p1118_p11), %s795_s10, 512, %s797_s28, %s783_s29, %s1055_s14, %s1056_s16, %s1057_s20  }
  0xa8 PF: > { %s811_s21 = sand.u32 1, %s1034_s6   ;;  %p1381_p7 = scmp.ge.s32.totalorder %s1046_s9, 2 }
  0xa9   : > { %s812_s22 = scalar_lea.sflag [#allocation4], %s811_s21 }
  0xaa   : > { %p903_p5 = pnand %p1381_p7, %p1122_p12 }
  0xac   : > { %p904_p8 = pneg %p903_p5 }
  0xae   : > { %1029 = dma.done.wait (%p904_p8), %s812_s22, 512  }
  0xaf   : > { %1031 = vsyncadd (%p904_p8), %s812_s22, 4294966784  ;;  %p14_p10 = scmp.ge.s32.totalorder %s1093_s12, 4   ;;  %s1382_s6 = smov %s1038_s7 }
  0xb0   : > { %s1383_s7 = smov %s1042_s8  ;;  %s1384_s8 = smov %s1105_s15 }
  0xb1   : > { %s1385_s9 = smov %s1093_s12  ;;  %16 = sbr.rel (!%p14_p10) target bundleno = 5 (0x5), region = 69 }
  0xb6   :  { %818 = vsyncpa [#allocation3], 1 }
  0xb7   :  { %820 = vsyncpa [#allocation3 + $0x1], 1 }
  0xb8   :  { %821 = vsyncpa [#allocation4], 1 }
  0xb9   :  { %823 = vsyncpa [#allocation4 + $0x1], 1 }

</bundles_post_ra>
